<compile_context>
chip_gen: v7x
topology: tpu7x:2x2x1
jax: 0.10.0
libtpu: 0.0.40
codegen_flags: <defaults>
</compile_context>

<pallas_src>
import functools

import jax
import jax.numpy as jnp
from jax.experimental import pallas as pl
from jax.experimental.pallas import tpu as pltpu


def _attention_kernel(x_ref, w1_ref, b1_ref, w2_ref, b2_ref, enc_ref, alpha_ref,
                      *, valid_s, chunk_s):
    """One grid step == one block of `Bblk` batch elements.

    x_ref:     [Bblk, S_pad, H]  lstm outputs for this batch block (VMEM)
    w1_ref:    [H, A]            projection weight (VMEM, resident across grid)
    b1_ref:    [1, A]            projection bias (VMEM)
    w2_ref:    [1, A]            attention weight as a row (VMEM)
    b2_ref:    [1, 1]            attention bias scalar (SMEM)
    enc_ref:   [Bblk, H]         attention-weighted encoding (output)
    alpha_ref: [Bblk, S_pad]     softmax attention weights (output)
    """
    bb, s, h = x_ref.shape
    a = w1_ref.shape[1]

    # Linear(H -> A) + ReLU over the whole batch block as ONE MXU matmul.
    # S_pad % 8 == 0 (wrapper pads), so this flatten is layout-free.
    x2d = x_ref[...].reshape(bb * s, h)
    proj = jnp.dot(x2d, w1_ref[...], preferred_element_type=jnp.float32)
    proj = jnp.maximum(proj + b1_ref[...], 0.0)                       # [Bb*S, A] f32

    # Linear(A -> 1): VPU multiply with the w2 row + lane reduction over A.
    scores = jnp.sum(proj.reshape(bb, s, a) * w2_ref[...], axis=-1)   # [Bb, S]
    scores = scores + b2_ref[0, 0]

    # Mask padded sequence positions (only present when seq_len % 8 != 0).
    if valid_s < s:
        col = jax.lax.broadcasted_iota(jnp.int32, (bb, s), 1)
        scores = jnp.where(col < valid_s, scores, -1e30)

    # Row-wise numerically-stable softmax over the sequence (lane) axis.
    m = jnp.max(scores, axis=-1, keepdims=True)
    e = jnp.exp(scores - m)
    denom = jnp.sum(e, axis=-1, keepdims=True)
    alphas = e * pl.reciprocal(denom, approx=False)                   # [Bb, S] f32
    alpha_ref[...] = alphas                                           # lane-dense store

    # Attention-weighted encoding, chunked over S so we never materialize a
    # second tile-sized [Bb, S, H] temp (keeps live VMEM ~= the x tile).
    acc = jnp.zeros((bb, h), jnp.float32)
    for c0 in range(0, s, chunk_s):
        c1 = min(c0 + chunk_s, s)
        xs = x_ref[:, c0:c1, :].astype(jnp.float32)                   # [Bb, sc, H]
        al = alphas[:, c0:c1]                                         # [Bb, sc]
        acc = acc + jnp.sum(xs * al[:, :, None], axis=1)
    enc_ref[...] = acc.astype(enc_ref.dtype)


def _vmem_capacity_bytes():
    """Per-TensorCore VMEM capacity; conservative 64 MiB (v7x) fallback."""
    try:
        info = pltpu.get_tpu_info()
        cap = getattr(info, "vmem_capacity_bytes", None)
        if cap:
            return int(cap)
    except Exception:
        pass
    return 64 << 20


def _choose_block_b(B, s_pad, H, itemsize, max_tile_bytes):
    """Batch-block size: as large as the per-generation tile budget allows,
    a multiple of 8 (so the (block_b, H)/(block_b, S) output blocks obey the
    (8,128) block-shape rule) unless a single block covers the whole batch,
    and <= ~B/2 for large B so v7x's second TensorCore gets >= 2 grid steps."""
    if B <= 8:
        return B                                 # full-dim block is always legal
    per_b = max(1, s_pad * H * itemsize)
    cap = max(1, max_tile_bytes // per_b)
    cap8 = max(8, (cap // 8) * 8)                # budget-limited, multiple of 8
    half8 = max(8, (B // 2 // 8) * 8)            # ~half the batch -> >= 2 steps
    return min(cap8, half8)


def custom_attention(lstm_outputs, w1, b1, w2_row, b2, *, block_b=None):
    """lstm_outputs: [B, S, H] (f32 or bf16); w1: [H, A]; b1: [A];
    w2_row: [1, A]; b2: [1].

    Returns (attention_weighted_encoding [B, H], alphas [B, S])."""
    B, S, H = lstm_outputs.shape
    A = w1.shape[1]
    x_dtype = lstm_outputs.dtype
    itemsize = jnp.dtype(x_dtype).itemsize

    # Pad seq_len to a multiple of 8 so the in-kernel flatten is layout-free.
    s_pad = ((S + 7) // 8) * 8
    x_in = lstm_outputs
    if s_pad != S:
        x_in = jnp.pad(lstm_outputs, ((0, 0), (0, s_pad - S), (0, 0)))

    vmem_cap = _vmem_capacity_bytes()
    max_tile_bytes = vmem_cap // 16              # ~8 MiB (v5e/v6e), ~4 MiB (v7x)
    if block_b is None:
        block_b = _choose_block_b(B, s_pad, H, itemsize, max_tile_bytes)
    elif block_b < B and block_b % 8 != 0:
        raise ValueError("block_b must be a multiple of 8 or cover the whole batch")
    block_b = min(block_b, B)
    grid = (pl.cdiv(B, block_b),)                # partial last block is masked

    tile_bytes = block_b * s_pad * H * itemsize
    # Live footprint ~ 2x double-buffered x tile + f32 proj temp + chunk temps
    # + weights; budget generously but never above half of physical VMEM.
    vmem_limit = int(min(vmem_cap // 2, max(32 << 20, 8 * tile_bytes)))

    # S-chunk for the weighted-sum reduction: ~8 slabs, multiple of 8.
    target = -(-s_pad // 8)
    chunk_s = min(s_pad, max(8, ((target + 7) // 8) * 8))

    w1_c = w1.astype(x_dtype)                    # match MXU operand dtypes (bf16 ok)
    b1_2d = b1.reshape(1, A).astype(jnp.float32)
    w2_2d = w2_row.reshape(1, A).astype(jnp.float32)
    b2_2d = b2.reshape(1, 1).astype(jnp.float32)

    cost = pl.CostEstimate(
        flops=int(2 * B * s_pad * H * A + 2 * B * s_pad * A + 2 * B * s_pad * H
                  + 6 * B * s_pad),
        transcendentals=int(B * s_pad),
        bytes_accessed=int(B * s_pad * H * itemsize + B * H * itemsize
                           + B * s_pad * 4 + H * A * itemsize + (2 * A + 1) * 4),
    )

    kernel = functools.partial(_attention_kernel, valid_s=S, chunk_s=chunk_s)

    enc, alphas_pad = pl.pallas_call(
        kernel,
        out_shape=(
            jax.ShapeDtypeStruct((B, H), x_dtype),
            jax.ShapeDtypeStruct((B, s_pad), jnp.float32),
        ),
        grid_spec=pltpu.PrefetchScalarGridSpec(
            num_scalar_prefetch=0,
            grid=grid,
            in_specs=[
                # x: one batch block per grid step (last two dims are full dims).
                pl.BlockSpec((block_b, s_pad, H), lambda b: (b, 0, 0)),
                # Weights/biases: constant index maps -> fetched once, resident.
                pl.BlockSpec((H, A), lambda b: (0, 0)),
                pl.BlockSpec((1, A), lambda b: (0, 0)),
                pl.BlockSpec((1, A), lambda b: (0, 0)),
                # Scalar bias lives in SMEM (no VMEM tile for a (1,1) block).
                pl.BlockSpec(memory_space=pltpu.MemorySpace.SMEM),
            ],
            out_specs=[
                pl.BlockSpec((block_b, H), lambda b: (b, 0)),
                pl.BlockSpec((block_b, s_pad), lambda b: (b, 0)),
            ],
        ),
        compiler_params=pltpu.CompilerParams(
            # Batch-block axis is embarrassingly parallel -> megacore split on v7x.
            dimension_semantics=("parallel",),
            vmem_limit_bytes=vmem_limit),
        cost_estimate=cost,
    )(x_in, w1_c, b1_2d, w2_2d, b2_2d)

    alphas = alphas_pad[:, :S] if s_pad != S else alphas_pad
    return enc, alphas


def _reference(lstm_outputs, w1, b1, w2_row, b2):
    x = lstm_outputs.astype(jnp.float32)
    proj = jnp.maximum(x @ w1.astype(jnp.float32) + b1, 0.0)          # [B, S, A]
    scores = jnp.sum(proj * w2_row[None, :, :], axis=-1) + b2[0]      # [B, S]
    alphas = jax.nn.softmax(scores, axis=1)
    enc = jnp.sum(x * alphas[..., None], axis=1)
    return enc, alphas


if __name__ == "__main__":
    key = jax.random.PRNGKey(0)
    k_x, k_w1, k_b1, k_w2, k_b2 = jax.random.split(key, 5)

    # --- Test 1: spec-sized f32 (batch=2, seq=8, hidden=32, attention_dim=16).
    B, S, H, A = 2, 8, 32, 16
    x = jax.random.normal(k_x, (B, S, H), dtype=jnp.float32)
    w1 = jax.random.normal(k_w1, (H, A), dtype=jnp.float32) * 0.1
    b1 = jax.random.normal(k_b1, (A,), dtype=jnp.float32) * 0.1
    w2 = jax.random.normal(k_w2, (1, A), dtype=jnp.float32) * 0.1    # row layout
    b2 = jax.random.normal(k_b2, (1,), dtype=jnp.float32) * 0.1

    enc, alphas = custom_attention(x, w1, b1, w2, b2)
    jax.block_until_ready((enc, alphas))
    enc_ref, alphas_ref = _reference(x, w1, b1, w2, b2)
    assert enc.shape == (B, H) and alphas.shape == (B, S)
    assert jnp.allclose(enc, enc_ref, atol=1e-5, rtol=1e-5)
    assert jnp.allclose(alphas, alphas_ref, atol=1e-5, rtol=1e-5)

    # --- Test 2: bf16 input DMA (halves HBM read traffic of the dominant array).
    x_bf16 = x.astype(jnp.bfloat16)
    enc_b, alphas_b = custom_attention(x_bf16, w1, b1, w2, b2)
    jax.block_until_ready((enc_b, alphas_b))
    enc_bref, alphas_bref = _reference(x_bf16, w1.astype(jnp.bfloat16), b1, w2, b2)
    assert jnp.allclose(enc_b.astype(jnp.float32), enc_bref, atol=5e-2, rtol=5e-2)
    assert jnp.allclose(alphas_b, alphas_bref, atol=2e-2, rtol=2e-2)

    # --- Test 3: larger batch (multiple-of-8 blocks, 2 grid steps) and a
    #     seq_len that is not a multiple of 8 (exercises padding + masking).
    B3, S3 = 16, 12
    x3 = jax.random.normal(jax.random.fold_in(k_x, 3), (B3, S3, H), dtype=jnp.float32)
    enc3, alphas3 = custom_attention(x3, w1, b1, w2, b2)
    jax.block_until_ready((enc3, alphas3))
    enc3_ref, alphas3_ref = _reference(x3, w1, b1, w2, b2)
    assert enc3.shape == (B3, H) and alphas3.shape == (B3, S3)
    assert jnp.allclose(enc3, enc3_ref, atol=1e-5, rtol=1e-5)
    assert jnp.allclose(alphas3, alphas3_ref, atol=1e-5, rtol=1e-5)

    print("KERNEL_OK")
</pallas_src>

<mosaic_0001>
module attributes {stable_mosaic.version = 11 : i64} {
  func.func @_attention_kernel(%arg0: i32, %arg1: memref<2x8x32xf32, #tpu.memory_space<vmem>>, %arg2: memref<32x16xf32, #tpu.memory_space<vmem>>, %arg3: memref<1x16xf32, #tpu.memory_space<vmem>>, %arg4: memref<1x16xf32, #tpu.memory_space<vmem>>, %arg5: memref<1x1xf32, #tpu.memory_space<smem>>, %arg6: memref<2x32xf32, #tpu.memory_space<vmem>>, %arg7: memref<2x8xf32, #tpu.memory_space<vmem>>) attributes {dimension_semantics = [#tpu.dimension_semantics<parallel>], iteration_bounds = array<i64: 1>, scalar_prefetch = 0 : i64, scratch_operands = 0 : i64, tpu.core_type = #tpu.core_type<tc>, window_params = [{transform_indices = @transform_0, window_bounds = array<i64: 2, 8, 32>}, {pipeline_mode = #tpu.pipeline_mode<synchronous>, transform_indices = @transform_1, window_bounds = array<i64: 32, 16>}, {pipeline_mode = #tpu.pipeline_mode<synchronous>, transform_indices = @transform_2, window_bounds = array<i64: 1, 16>}, {pipeline_mode = #tpu.pipeline_mode<synchronous>, transform_indices = @transform_3, window_bounds = array<i64: 1, 16>}, {transform_indices = @transform_4, window_bounds = array<i64: 1, 1>}, {transform_indices = @transform_5, window_bounds = array<i64: 2, 32>}, {transform_indices = @transform_6, window_bounds = array<i64: 2, 8>}]} {
    %c0 = arith.constant 0 : index
    %c0_0 = arith.constant 0 : index
    %c0_1 = arith.constant 0 : index
    %0 = vector.load %arg1[%c0, %c0_0, %c0_1] : memref<2x8x32xf32, #tpu.memory_space<vmem>>, vector<2x8x32xf32>
    %1 = vector.shape_cast %0 : vector<2x8x32xf32> to vector<16x32xf32>
    %c0_2 = arith.constant 0 : index
    %c0_3 = arith.constant 0 : index
    %2 = vector.load %arg2[%c0_2, %c0_3] : memref<32x16xf32, #tpu.memory_space<vmem>>, vector<32x16xf32>
    %cst = arith.constant dense<0.000000e+00> : vector<16x16xf32>
    %3 = tpu.matmul %1, %2, %cst {dimension_numbers = #tpu.dot_dimension_numbers<[1], [0], [0], [1], [0, 0, 1, 1], [], []>} : vector<16x32xf32>, vector<32x16xf32>, vector<16x16xf32> -> vector<16x16xf32>
    %c0_4 = arith.constant 0 : index
    %c0_5 = arith.constant 0 : index
    %4 = vector.load %arg3[%c0_4, %c0_5] : memref<1x16xf32, #tpu.memory_space<vmem>>, vector<1x16xf32>
    %5 = vector.broadcast %4 : vector<1x16xf32> to vector<16x16xf32>
    %6 = arith.addf %3, %5 : vector<16x16xf32>
    %cst_6 = arith.constant 0.000000e+00 : f32
    %7 = vector.broadcast %cst_6 : f32 to vector<16x16xf32>
    %8 = arith.maximumf %6, %7 : vector<16x16xf32>
    %9 = vector.shape_cast %8 : vector<16x16xf32> to vector<2x8x16xf32>
    %c0_7 = arith.constant 0 : index
    %c0_8 = arith.constant 0 : index
    %10 = vector.load %arg4[%c0_7, %c0_8] : memref<1x16xf32, #tpu.memory_space<vmem>>, vector<1x16xf32>
    %11 = vector.shape_cast %10 : vector<1x16xf32> to vector<1x1x16xf32>
    %12 = vector.broadcast %11 : vector<1x1x16xf32> to vector<2x8x16xf32>
    %13 = arith.mulf %9, %12 : vector<2x8x16xf32>
    %cst_9 = arith.constant dense<0.000000e+00> : vector<2x8xf32>
    %14 = vector.multi_reduction <add>, %13, %cst_9 [2] : vector<2x8x16xf32> to vector<2x8xf32>
    %c0_10 = arith.constant 0 : index
    %c0_11 = arith.constant 0 : index
    %15 = memref.load %arg5[%c0_10, %c0_11] : memref<1x1xf32, #tpu.memory_space<smem>>
    %16 = vector.broadcast %15 : f32 to vector<2x8xf32>
    %17 = arith.addf %14, %16 : vector<2x8xf32>
    %cst_12 = arith.constant dense<0xFF800000> : vector<2xf32>
    %18 = vector.multi_reduction <maximumf>, %17, %cst_12 [1] : vector<2x8xf32> to vector<2xf32>
    %19 = vector.shape_cast %18 : vector<2xf32> to vector<2x1xf32>
    %20 = vector.broadcast %19 : vector<2x1xf32> to vector<2x8xf32>
    %21 = arith.subf %17, %20 : vector<2x8xf32>
    %22 = math.exp %21 : vector<2x8xf32>
    %cst_13 = arith.constant dense<0.000000e+00> : vector<2xf32>
    %23 = vector.multi_reduction <add>, %22, %cst_13 [1] : vector<2x8xf32> to vector<2xf32>
    %24 = vector.shape_cast %23 : vector<2xf32> to vector<2x1xf32>
    %25 = tpu.reciprocal %24 : vector<2x1xf32> -> vector<2x1xf32>
    %26 = vector.broadcast %25 : vector<2x1xf32> to vector<2x8xf32>
    %27 = arith.mulf %22, %26 : vector<2x8xf32>
    %c0_14 = arith.constant 0 : index
    %c0_15 = arith.constant 0 : index
    %28 = vector.load %arg7[%c0_14, %c0_15] : memref<2x8xf32, #tpu.memory_space<vmem>>, vector<2x8xf32>
    tpu.vector_store %arg7[%c0_14, %c0_15], %27 {strides = array<i32>} : memref<2x8xf32, #tpu.memory_space<vmem>>, vector<2x8xf32>,
    %cst_16 = arith.constant 0.000000e+00 : f32
    %29 = vector.broadcast %cst_16 : f32 to vector<2x32xf32>
    %c0_17 = arith.constant 0 : index
    %c0_18 = arith.constant 0 : index
    %c0_19 = arith.constant 0 : index
    %30 = vector.load %arg1[%c0_17, %c0_18, %c0_19] : memref<2x8x32xf32, #tpu.memory_space<vmem>>, vector<2x8x32xf32>
    %31 = vector.shape_cast %27 : vector<2x8xf32> to vector<2x8x1xf32>
    %32 = vector.broadcast %31 : vector<2x8x1xf32> to vector<2x8x32xf32>
    %33 = arith.mulf %30, %32 : vector<2x8x32xf32>
    %cst_20 = arith.constant dense<0.000000e+00> : vector<2x32xf32>
    %34 = vector.multi_reduction <add>, %33, %cst_20 [1] : vector<2x8x32xf32> to vector<2x32xf32>
    %35 = arith.addf %29, %34 : vector<2x32xf32>
    %c0_21 = arith.constant 0 : index
    %c0_22 = arith.constant 0 : index
    %36 = vector.load %arg6[%c0_21, %c0_22] : memref<2x32xf32, #tpu.memory_space<vmem>>, vector<2x32xf32>
    tpu.vector_store %arg6[%c0_21, %c0_22], %35 {strides = array<i32>} : memref<2x32xf32, #tpu.memory_space<vmem>>, vector<2x32xf32>,
    return
  }
  func.func @transform_0(%arg0: i32) -> (i32, i32, i32) {
    %c0_i32 = arith.constant 0 : i32
    %c0_i32_0 = arith.constant 0 : i32
    %c0_i32_1 = arith.constant 0 : i32
    return %arg0, %c0_i32, %c0_i32_0 : i32, i32, i32
  }
  func.func @transform_1(%arg0: i32) -> (i32, i32) {
    %c0_i32 = arith.constant 0 : i32
    %c0_i32_0 = arith.constant 0 : i32
    %c0_i32_1 = arith.constant 0 : i32
    return %c0_i32, %c0_i32_0 : i32, i32
  }
  func.func @transform_2(%arg0: i32) -> (i32, i32) {
    %c0_i32 = arith.constant 0 : i32
    %c0_i32_0 = arith.constant 0 : i32
    %c0_i32_1 = arith.constant 0 : i32
    return %c0_i32, %c0_i32_0 : i32, i32
  }
  func.func @transform_3(%arg0: i32) -> (i32, i32) {
    %c0_i32 = arith.constant 0 : i32
    %c0_i32_0 = arith.constant 0 : i32
    %c0_i32_1 = arith.constant 0 : i32
    return %c0_i32, %c0_i32_0 : i32, i32
  }
  func.func @transform_4(%arg0: i32) -> (i32, i32) {
    %c0_i32 = arith.constant 0 : i32
    %c0_i32_0 = arith.constant 0 : i32
    %c0_i32_1 = arith.constant 0 : i32
    return %c0_i32, %c0_i32_0 : i32, i32
  }
  func.func @transform_5(%arg0: i32) -> (i32, i32) {
    %c0_i32 = arith.constant 0 : i32
    %c0_i32_0 = arith.constant 0 : i32
    return %arg0, %c0_i32 : i32, i32
  }
  func.func @transform_6(%arg0: i32) -> (i32, i32) {
    %c0_i32 = arith.constant 0 : i32
    %c0_i32_0 = arith.constant 0 : i32
    return %arg0, %c0_i32 : i32, i32
  }
}

</mosaic_0001>

<bundles_post_ra>
// kernel: tpu_custom_call.1
= control target key start
LH: loop header
LB: loop body
LE: loop exit
PB: predicated region body
PF: predicated region fallthrough
CT: control target
= control target key end

     0   :  { %13 = vsyncpa [#allocation4], 0  ;;  %vm38_vm0 = vcmask 261120   ;;  %s484_s0 = inlined_call_operand.vmem [shape: f32[2,8,32], index: 0, kind: input, shape index: {}]   ;;  %s485_s1 = inlined_call_operand.vmem [shape: f32[32,16], index: 1, kind: input, shape index: {}]   ;;  %s486_s2 = inlined_call_operand.vmem [shape: f32[1,16], index: 2, kind: input, shape index: {}]   ;;  %s487_s3 = inlined_call_operand.vmem [shape: f32[1,16], index: 3, kind: input, shape index: {}]   ;;  %s488_s4 = inlined_call_operand.<no memory space> [shape: f32[1,1], index: 4, kind: input, shape index: {}]   ;;  %s489_s5 = inlined_call_operand.hbm [shape: f32[2,32], index: 5, kind: output, shape index: {0}]   ;;  %s490_s6 = inlined_call_operand.hbm [shape: f32[2,8], index: 6, kind: output, shape index: {1}]  }
   0x1   :  { %v27_v0 = vld [vmem:[%s485_s1] sm:$0xff]  ;;  %v28_v1 = vld [vmem:[%s485_s1 + $0x8] sm:$0xff]  ;;  %v29_v2 = vld [vmem:[%s485_s1 + $0x10] sm:$0xff] }
   0x2   :  { %v309_v3 = vpack.c.bf16 %v28_v1, %v27_v0  ;;  %v30_v4 = vld [vmem:[%s485_s1 + $0x18] sm:$0xff]  ;;  %v429_v5 = vld [vmem:[%s484_s0] sm:$0xff] }
   0x3   :  { %v313_v6 = vpack.c.bf16 %v30_v4, %v29_v2  ;;  %306 = vmatprep.mubr.msk.f32.mxu0 %vm38_vm0, %v429_v5 }
   0x4   :  { %14 = vsyncpa [#allocation6], 0  ;;  %310 = vmatprep.subr.bf16.mxu0 %v309_v3  ;;  %v436_v7 = vld [vmem:[%s484_s0 + $0x8] sm:$0xff]  ;;  %v288_v8 = vld [vmem:[%s486_s2] ss:$0 sm:$0xff]  ;;  %vm131_vm1 = vcmask 130048   ;;  %v144_v20 = vlaneseq  ;;  %v139_v23 = vstv %s488_s4 }
   0x5   :  { %312 = vmatpush3.bf16.msra.mxu0 %v309_v3  ;;  %v291_v13 = vld [vmem:[%s487_s3] ss:$0 sm:$0xff]  ;;  %vm154_vm2 = vcmask 1041409   ;;  %vm157_vm3 = vcmask 58368   ;;  %v376_v33 = vmov 0   ;;  %s377_s3 = smov [#allocation5]  }
   0x6   :  { %314 = vmatprep.subr.bf16.mxu0 %v313_v6  ;;  %v145_v21 = vand.u32 127, %v144_v20  ;;  %v147_v22 = vshrl.u32 %v144_v20, 7  ;;  %321 = vset.pattern.permute.xlu0 %v376_v33  ;;  %s276_s4 = sshll.u32 %s377_s3, 4  ;;  %s277_s4 = int_to_ptr.vmem [resolvable:$true] %s276_s4 }
   0x7   :  { %320 = vset.pattern.permute.xlu1 %v376_v33  ;;  %s328_s12 = scalar_lea.vmem %s277_s4, 32  ;;  %p333_p1 = scmp.lt.s32.totalorder %s277_s4, %s277_s4 }
   0x8   :  { %v148_v25 = vsub.s32 %v145_v21, %v147_v22  ;;  %v164_v34 = vsub.s32 0, %v147_v22  ;;  %v168_v35 = vsub.s32 1, %v147_v22  ;;  %p329_p0 = scmp.ne.s32.totalorder %s277_s4, %s328_s12  ;;  %p334_p2 = scmp.lt.s32.totalorder %s328_s12, %s328_s12 }
   0x9   :  { %316 = vmatpush3.bf16.msra.mxu0 %v313_v6 }
   0xa   :  { %p335_p3 = por %p334_p2, %p333_p1 }
   0xc   :  { %307 = vmatmul.mubr.msk.f32.vlgmr.msra.gmra.mrb[0].mxu0 %vm38_vm0, %v436_v7  ;;  %p336_p4 = pnand %p335_p3, %p329_p0 }
  0xdf   :  { %v308_v9 = vpop.f32.mrb[0].mxu0 }
  0xe0   :  { %v117_v10 = vadd.f32 %v308_v9, %v288_v8  ;;  %v111_v11 = vpop.f32.mrb[1].mxu0 }
  0xe1   :  { %v112_v12 = vadd.f32 %v288_v8, %v111_v11 }
  0xe2   :  { %v121_v14 = vmax.f32 %v117_v10, 0.0 }
  0xe3   :  { %v120_v15 = vmax.f32 %v112_v12, 0.0 }
  0xe4   :  { %v130_v18 = vmul.f32 %v291_v13, %v121_v14 }
  0xe5   :  { %v129_v16 = vmul.f32 %v291_v13, %v120_v15 }
  0xe6   :  { %v135_v19 = vsel %vm131_vm1, %v130_v18, 0.0 }
  0xe7   :  { %v132_v17 = vsel %vm131_vm1, %v129_v16, 0.0 }
  0xe8   :  { %133 = vadd.xlane.f32.xlu0 %v132_v17 }
  0xec   :  { %136 = vadd.xlane.f32.xlu0 %v135_v19 }
 0x175   :  { %v134_v24 = vpop.xlane.xlu0 %133 }
 0x176   :  { %v140_v26 = vadd.f32 %v139_v23, %v134_v24 }
 0x178   :  { %v149_v29 = vrot.slane %v140_v26, %v148_v25 }
 0x179   :  { %v137_v27 = vpop.xlane.xlu0 %136 }
 0x17a   :  { %v141_v28 = vadd.f32 %v139_v23, %v137_v27 }
 0x17c   :  { %v153_v30 = vrot.slane %v141_v28, %v148_v25 }
 0x17e   :  { %v155_v31 = vsel %vm154_vm2, %v153_v30, %v149_v29 }
 0x17f   :  { %v158_v32 = vsel %vm157_vm3, %v155_v31, -inf }
 0x180   :  { %159 = vmax.xlane.f32.xlu1 %v158_v32 }
 0x20d   :  { %v160_v36 = vpop.xlane.xlu1 %159 }
 0x20e   :  { %v165_v37 = vrot.slane %v160_v36, %v164_v34  ;;  %v169_v38 = vrot.slane %v160_v36, %v168_v35 }
 0x210   :  { %v172_v39 = vsub.f32 %v140_v26, %v165_v37  ;;  %v173_v40 = vsub.f32 %v141_v28, %v169_v38 }
 0x212   :  { %v174_v41 = vmul.f32 1.442695, %v172_v39  ;;  %v176_v42 = vmul.f32 1.442695, %v173_v40 }
 0x214   :  { %322 = vpow2.f32 %v174_v41 }
 0x215   :  { %324 = vpow2.f32 %v176_v42 }
 0x21e   :  { %v323_v43 = vpop.eup %322 }
 0x21f   :  { %v325_v44 = vpop.eup %324  ;;  %181 = vperm.xlu1 %320, %v323_v43  }
 0x220   :  { %184 = vperm.xlu0 %321, %v325_v44  }
 0x29e   :  { %v182_v45 = vpop.permute.xlu1 %181 }
 0x29f   :  { %v185_v46 = vpop.permute.xlu0 %184  ;;  %v189_v47 = vrot.slane %v182_v45, %v148_v25 }
 0x2a0   :  { %v193_v48 = vrot.slane %v185_v46, %v148_v25 }
 0x2a2   :  { %v194_v49 = vsel %vm154_vm2, %v193_v48, %v189_v47 }
 0x2a3   :  { %v196_v50 = vsel %vm157_vm3, %v194_v49, 0.0 }
 0x2a4   :  { %197 = vadd.xlane.f32.xlu1 %v196_v50 }
 0x331   :  { %v198_v51 = vpop.xlane.xlu1 %197 }
 0x332   :  { %326 = vrcp.f32 %v198_v51 }
 0x33c   :  { %v327_v52 = vpop.eup %326 }
 0x33d   :  { %v204_v53 = vrot.slane %v327_v52, %v164_v34  ;;  %v208_v55 = vrot.slane %v327_v52, %v168_v35 }
 0x33f   :  { %v211_v54 = vmul.f32 %v323_v43, %v204_v53  ;;  %v212_v56 = vmul.f32 %v325_v44, %v208_v55 }
 0x341   :  { %216 = vperm.xlu0 %321, %v211_v54  }
 0x345   :  { %219 = vperm.xlu0 %321, %v212_v56  }
 0x3c0   :  { %v217_v57 = vpop.permute.xlu0 %216 }
 0x3c1   :  { %v236_v58 = vmul.f32 %v217_v57, %v429_v5  ;;  %v224_v62 = vrot.slane %v217_v57, %v148_v25 }
 0x3c3   :  { %v238_v59 = vsel %vm38_vm0, %v236_v58, 0.0 }
 0x3c4   :  { %v239_v60 = vrot.slane %v238_v59, 4  ;;  %v220_v61 = vpop.permute.xlu0 %219 }
 0x3c5   :  { %v228_v63 = vrot.slane %v220_v61, %v148_v25  ;;  %v237_v0 = vmul.f32 %v220_v61, %v436_v7 }
 0x3c6   :  { %v240_v1 = vadd.f32 %v239_v60, %v238_v59 }
 0x3c7   :  { %v245_v2 = vsel %vm38_vm0, %v237_v0, 0.0  ;;  %v229_v3 = vsel %vm154_vm2, %v228_v63, %v224_v62 }
 0x3c8   :  { %v241_v4 = vrot.slane %v240_v1, 2  ;;  %v246_v6 = vrot.slane %v245_v2, 4  ;;  %231 = vst.msk [vmem:[#allocation5] sm:$0x3] %vm157_vm3, %v229_v3 }
 0x3c9   :  { %339 = shalt.err (!%p336_p4)
}
 0x3ca   :  { %s340_s15 = scalar_lea.hbm %s490_s6, 32 }
 0x3cb   :  { %p341_p5 = scmp.ne.s32.totalorder %s490_s6, %s340_s15  ;;  %p344_p6 = scmp.lt.u32.totalorder %s340_s15, %s490_s6 }
 0x3cd   :  { %p346_p7 = pnand %p344_p6, %p341_p5 }
 0x3cf   :  { %349 = shalt.err (!%p346_p7)
}
 0x3d0   :  { %279 = dma.vmem_to_hbm [thread:$0]  %s277_s4, 32, %s490_s6, [#allocation6]   ;;  %v242_v5 = vadd.f32 %v241_v4, %v240_v1  ;;  %v247_v7 = vadd.f32 %v246_v6, %v245_v2  ;;  %vm258_vm4 = vcmask 254976  }
 0x3d1   :  { %s378_s22 = smov [#allocation3]  }
 0x3d2   :  { %v248_v8 = vrot.slane %v247_v7, 2  ;;  %v243_v10 = vrot.slane %v242_v5, 1  ;;  %s266_s23 = sshll.u32 %s378_s22, 4  ;;  %s267_s23 = int_to_ptr.vmem [resolvable:$true] %s266_s23 }
 0x3d3   :  { %s350_s24 = scalar_lea.vmem %s267_s23, 32  ;;  %p355_p9 = scmp.lt.s32.totalorder %s267_s23, %s267_s23 }
 0x3d4   :  { %v249_v9 = vadd.f32 %v248_v8, %v247_v7  ;;  %v244_v12 = vadd.f32 %v243_v10, %v242_v5  ;;  %p351_p8 = scmp.ne.s32.totalorder %s267_s23, %s350_s24  ;;  %p356_p10 = scmp.lt.s32.totalorder %s350_s24, %s350_s24 }
 0x3d6   :  { %v250_v11 = vrot.slane %v249_v9, 1  ;;  %p357_p11 = por %p356_p10, %p355_p9 }
 0x3d8   :  { %v251_v13 = vadd.f32 %v250_v11, %v249_v9  ;;  %p358_p12 = pnand %p357_p11, %p351_p8 }
 0x3da   :  { %v256_v14 = vsel %vm154_vm2, %v251_v13, %v244_v12 }
 0x3db   :  { %259 = vst.msk [vmem:[#allocation3] sm:$0x3] %vm258_vm4, %v256_v14 }
 0x3dc   :  { %361 = shalt.err (!%p358_p12)
}
 0x3dd   :  { %s362_s26 = scalar_lea.hbm %s489_s5, 32 }
 0x3de   :  { %p363_p13 = scmp.ne.s32.totalorder %s489_s5, %s362_s26  ;;  %p366_p0 = scmp.lt.u32.totalorder %s362_s26, %s489_s5 }
 0x3e0   :  { %p368_p1 = pnand %p366_p0, %p363_p13 }
 0x3e2   :  { %371 = shalt.err (!%p368_p1)
}
 0x3e3   :  { %269 = dma.vmem_to_hbm [thread:$0]  %s267_s23, 32, %s489_s5, [#allocation4]  }
 0x3e4   :  { %372 = dma.done.wait [#allocation4], 32  }
 0x3e5   :  { %373 = vsyncadd [#allocation4], 4294967264 }
 0x3e6   :  { %374 = dma.done.wait [#allocation6], 32  }
 0x3e7   :  { %375 = vsyncadd [#allocation6], 4294967264 }
 0x3e8   :  { %286 = vsyncpa [#allocation4], 1 }
 0x3e9   :  { %287 = vsyncpa [#allocation6], 1 }

</bundles_post_ra>
